<compile_context>
chip_gen: v5e
topology: v5e:2x2
jax: 0.10.0
libtpu: 0.0.40
codegen_flags: <defaults>
</compile_context>

<pallas_src>
import jax
import jax.numpy as jnp
from jax.experimental import pallas as pl
from jax.experimental.pallas import tpu as pltpu


# ---------------------------------------------------------------------------
# Kernel
# ---------------------------------------------------------------------------
def _gate_kernel(x_ref, w_ref, b_ref, o_ref):
    # x_ref: [TB, D]  streamed per grid step (double-buffered by the pipeline)
    # w_ref: [D, E]   pre-transposed, grid-invariant (resident)
    # b_ref: [1, E]   f32, grid-invariant (resident)
    # o_ref: [TB, E]  or lane-dense [TB*E//128, 128]
    logits = jnp.dot(x_ref[...], w_ref[...],
                     preferred_element_type=jnp.float32) + b_ref[...]
    # Numerically-stable softmax over the expert axis, f32, EXACT normalization.
    m = jnp.max(logits, axis=-1, keepdims=True)
    e = jnp.exp(logits - m)
    probs = e / jnp.sum(e, axis=-1, keepdims=True)
    # Identity reshape on the non-dense path; lane-densifying reshape otherwise.
    o_ref[...] = probs.astype(o_ref.dtype).reshape(o_ref.shape)


# ---------------------------------------------------------------------------
# Tiling / VMEM-budget helpers
# ---------------------------------------------------------------------------
def _round_up(x, m):
    return -(-x // m) * m


def _round_down(x, m):
    return (x // m) * m


def _vmem_budget_bytes():
    """Conservative per-core VMEM budget for the pipeline working set."""
    cap = 64 << 20  # v7x per-TC physical VMEM: the most constrained generation
    try:
        cap = int(getattr(pltpu.get_tpu_info(), "vmem_capacity_bytes", cap))
    except Exception:
        pass
    # ~40% of physical, capped at 48 MiB: headroom for compiler scratch etc.
    return min(int(cap * 0.4), 48 << 20)


def _dense_ok(tb, E):
    # Lane-dense output: reshape (TB, E) -> (TB*E//128, 128); rows must stay a
    # multiple of 8 sublanes -> TB*E % 1024 == 0.
    return (E < 128) and (tb % 128 == 0) and ((tb * E) % 1024 == 0)


def _footprint_bytes(tb, D, E, x_bytes, o_bytes, w_bytes):
    """Pipeline VMEM working set, using (8,128)-padded block sizes."""
    d_pad = _round_up(D, 128)
    x_buf = tb * d_pad * x_bytes
    if _dense_ok(tb, E):
        out_buf = tb * E * o_bytes                       # 128-lane-dense block
    else:
        out_buf = tb * _round_up(E, 128) * o_bytes       # lane-padded block
    w_buf = _round_up(D, 8) * _round_up(E, 128) * w_bytes
    b_buf = 8 * _round_up(E, 128) * 4
    # x/out double-buffered; W/bias conservatively counted twice as well.
    return 2 * (x_buf + out_buf + w_buf + b_buf)


def _pick_block_rows(B, D, E, x_bytes, o_bytes, w_bytes, budget):
    # Target a MiB-scale streamed x tile (per-step overhead ~0.35us; measured
    # ~85% of HBM roofline once tiles are MiB-scale), rows multiple of 128.
    tb = max(128, _round_down(max(128, (4 << 20) // max(1, D * x_bytes)), 128))
    # Keep >= 2 grid steps for large batches so both TensorCores on multi-TC
    # chips (v7x) get work via dimension_semantics=("parallel",).
    if B >= 512:
        tb = min(tb, max(128, _round_up(-(-B // 2), 128)))
    # Shrink until the double-buffered pipeline fits the VMEM budget.
    while tb > 8 and _footprint_bytes(tb, D, E, x_bytes, o_bytes, w_bytes) > budget:
        tb //= 2
    if tb >= B:
        tb = B  # single full-batch block (block_shape == array dims is legal)
    return tb, _footprint_bytes(tb, D, E, x_bytes, o_bytes, w_bytes)


# ---------------------------------------------------------------------------
# Wrapper
# ---------------------------------------------------------------------------
def gate_forward(x, weight, bias):
    """x: [B, D_in], weight: [E, D_in] (nn.Linear layout), bias: [E] -> [B, E]."""
    B, D = x.shape
    E = weight.shape[0]
    out_dtype = x.dtype

    # One-time layout prep (wrapper, not per grid step): weight transposed to
    # [D, E] and matched to the activation dtype; bias kept f32 (softmax math
    # stays f32).  No wrapper-side cast/pad of x — no extra HBM pass over it.
    w_t = jnp.asarray(weight).T.astype(x.dtype)
    b2 = jnp.asarray(bias).reshape(1, E).astype(jnp.float32)

    x_bytes = jnp.dtype(x.dtype).itemsize
    w_bytes = jnp.dtype(w_t.dtype).itemsize
    o_bytes = jnp.dtype(out_dtype).itemsize

    budget = _vmem_budget_bytes()
    tb, footprint = _pick_block_rows(B, D, E, x_bytes, o_bytes, w_bytes, budget)
    grid = pl.cdiv(B, tb)
    dense = _dense_ok(tb, E)

    if dense:
        rows_per_blk = (tb * E) // 128
        out_shape = jax.ShapeDtypeStruct((grid * rows_per_blk, 128), out_dtype)
        out_spec = pl.BlockSpec((rows_per_blk, 128), lambda i: (i, 0))
    else:
        out_shape = jax.ShapeDtypeStruct((B, E), out_dtype)
        out_spec = pl.BlockSpec((tb, E), lambda i: (i, 0))

    cost = pl.CostEstimate(
        flops=2 * grid * tb * D * E,
        transcendentals=grid * tb * E,
        bytes_accessed=(B * D * x_bytes + D * E * w_bytes
                        + grid * tb * E * o_bytes),
    )

    out = pl.pallas_call(
        _gate_kernel,
        out_shape=out_shape,
        grid_spec=pltpu.PrefetchScalarGridSpec(
            num_scalar_prefetch=0,
            grid=(grid,),
            in_specs=[
                pl.BlockSpec((tb, D), lambda i: (i, 0)),   # streamed x tile
                pl.BlockSpec((D, E), lambda i: (0, 0)),    # resident weight
                pl.BlockSpec((1, E), lambda i: (0, 0)),    # resident bias
            ],
            out_specs=out_spec,
        ),
        compiler_params=pltpu.CompilerParams(
            dimension_semantics=("parallel",),             # megacore on v7x
            vmem_limit_bytes=int(min(max(32 << 20, footprint + (8 << 20)),
                                     56 << 20)),
        ),
        cost_estimate=cost,
    )(x, w_t, b2)

    if dense:
        # Tiny [*, E] reshape/slice (no x-sized pad/copy anywhere).
        out = out.reshape(grid * tb, E)
        if grid * tb != B:
            out = out[:B]
    return out


def init_gate_params(key, dim_in, expert_num):
    """Deterministic init matching nn.Linear default (uniform +-1/sqrt(dim_in))."""
    kw, kb = jax.random.split(key)
    bound = 1.0 / jnp.sqrt(jnp.float32(dim_in))
    weight = jax.random.uniform(
        kw, (expert_num, dim_in), minval=-bound, maxval=bound, dtype=jnp.float32
    )
    bias = jax.random.uniform(
        kb, (expert_num,), minval=-bound, maxval=bound, dtype=jnp.float32
    )
    return weight, bias


if __name__ == "__main__":
    key = jax.random.PRNGKey(0)
    k_x, k_p, k_x2 = jax.random.split(key, 3)

    dim_in, expert_num = 32, 8
    weight, bias = init_gate_params(k_p, dim_in, expert_num)

    # Small single-block case (full-batch block, plain output path).
    batch = 8
    x = jax.random.normal(k_x, (batch, dim_in), dtype=jnp.float32)
    out = jax.block_until_ready(gate_forward(x, weight, bias))
    ref = jax.nn.softmax(x @ weight.T + bias, axis=-1)
    assert out.shape == (batch, expert_num)
    assert jnp.allclose(out, ref, atol=2e-3, rtol=2e-3)
    assert jnp.allclose(jnp.sum(out, axis=-1), 1.0, atol=1e-3)

    # Ragged multi-block case: grid = cdiv(B, TB), lane-dense output, no pad.
    batch2 = 1000
    x2 = jax.random.normal(k_x2, (batch2, dim_in), dtype=jnp.float32)
    out2 = jax.block_until_ready(gate_forward(x2, weight, bias))
    ref2 = jax.nn.softmax(x2 @ weight.T + bias, axis=-1)
    assert out2.shape == (batch2, expert_num)
    assert jnp.allclose(out2, ref2, atol=2e-3, rtol=2e-3)
    assert jnp.allclose(jnp.sum(out2, axis=-1), 1.0, atol=1e-3)

    # bf16 activations (caller-provided): halves the dominant HBM x stream.
    x3 = x2.astype(jnp.bfloat16)
    out3 = jax.block_until_ready(gate_forward(x3, weight, bias))
    ref3 = jax.nn.softmax(x3.astype(jnp.float32) @ weight.T + bias, axis=-1)
    assert out3.dtype == jnp.bfloat16
    assert jnp.allclose(out3.astype(jnp.float32), ref3, atol=3e-2)

    print("KERNEL_OK")
</pallas_src>

<mosaic_0001>
module attributes {stable_mosaic.version = 11 : i64} {
  func.func @_gate_kernel(%arg0: i32, %arg1: memref<8x32xf32, #tpu.memory_space<vmem>>, %arg2: memref<32x8xf32, #tpu.memory_space<vmem>>, %arg3: memref<1x8xf32, #tpu.memory_space<vmem>>, %arg4: memref<8x8xf32, #tpu.memory_space<vmem>>) attributes {dimension_semantics = [#tpu.dimension_semantics<parallel>], iteration_bounds = array<i64: 1>, scalar_prefetch = 0 : i64, scratch_operands = 0 : i64, tpu.core_type = #tpu.core_type<tc>, window_params = [{transform_indices = @transform_0, window_bounds = array<i64: 8, 32>}, {pipeline_mode = #tpu.pipeline_mode<synchronous>, transform_indices = @transform_1, window_bounds = array<i64: 32, 8>}, {pipeline_mode = #tpu.pipeline_mode<synchronous>, transform_indices = @transform_2, window_bounds = array<i64: 1, 8>}, {transform_indices = @transform_3, window_bounds = array<i64: 8, 8>}]} {
    %c0 = arith.constant 0 : index
    %c0_0 = arith.constant 0 : index
    %0 = vector.load %arg1[%c0, %c0_0] : memref<8x32xf32, #tpu.memory_space<vmem>>, vector<8x32xf32>
    %c0_1 = arith.constant 0 : index
    %c0_2 = arith.constant 0 : index
    %1 = vector.load %arg2[%c0_1, %c0_2] : memref<32x8xf32, #tpu.memory_space<vmem>>, vector<32x8xf32>
    %cst = arith.constant dense<0.000000e+00> : vector<8x8xf32>
    %2 = tpu.matmul %0, %1, %cst {dimension_numbers = #tpu.dot_dimension_numbers<[1], [0], [0], [1], [0, 0, 1, 1], [], []>} : vector<8x32xf32>, vector<32x8xf32>, vector<8x8xf32> -> vector<8x8xf32>
    %c0_3 = arith.constant 0 : index
    %c0_4 = arith.constant 0 : index
    %3 = vector.load %arg3[%c0_3, %c0_4] : memref<1x8xf32, #tpu.memory_space<vmem>>, vector<1x8xf32>
    %4 = vector.broadcast %3 : vector<1x8xf32> to vector<8x8xf32>
    %5 = arith.addf %2, %4 : vector<8x8xf32>
    %cst_5 = arith.constant dense<0xFF800000> : vector<8xf32>
    %6 = vector.multi_reduction <maximumf>, %5, %cst_5 [1] : vector<8x8xf32> to vector<8xf32>
    %7 = vector.shape_cast %6 : vector<8xf32> to vector<8x1xf32>
    %8 = vector.broadcast %7 : vector<8x1xf32> to vector<8x8xf32>
    %9 = arith.subf %5, %8 : vector<8x8xf32>
    %10 = math.exp %9 : vector<8x8xf32>
    %cst_6 = arith.constant dense<0.000000e+00> : vector<8xf32>
    %11 = vector.multi_reduction <add>, %10, %cst_6 [1] : vector<8x8xf32> to vector<8xf32>
    %12 = vector.shape_cast %11 : vector<8xf32> to vector<8x1xf32>
    %13 = vector.broadcast %12 : vector<8x1xf32> to vector<8x8xf32>
    %14 = arith.divf %10, %13 : vector<8x8xf32>
    %c0_7 = arith.constant 0 : index
    %c0_8 = arith.constant 0 : index
    %15 = vector.load %arg4[%c0_7, %c0_8] : memref<8x8xf32, #tpu.memory_space<vmem>>, vector<8x8xf32>
    tpu.vector_store %arg4[%c0_7, %c0_8], %14 {strides = array<i32>} : memref<8x8xf32, #tpu.memory_space<vmem>>, vector<8x8xf32>,
    return
  }
  func.func @transform_0(%arg0: i32) -> (i32, i32) {
    %c0_i32 = arith.constant 0 : i32
    %c0_i32_0 = arith.constant 0 : i32
    return %arg0, %c0_i32 : i32, i32
  }
  func.func @transform_1(%arg0: i32) -> (i32, i32) {
    %c0_i32 = arith.constant 0 : i32
    %c0_i32_0 = arith.constant 0 : i32
    %c0_i32_1 = arith.constant 0 : i32
    return %c0_i32, %c0_i32_0 : i32, i32
  }
  func.func @transform_2(%arg0: i32) -> (i32, i32) {
    %c0_i32 = arith.constant 0 : i32
    %c0_i32_0 = arith.constant 0 : i32
    %c0_i32_1 = arith.constant 0 : i32
    return %c0_i32, %c0_i32_0 : i32, i32
  }
  func.func @transform_3(%arg0: i32) -> (i32, i32) {
    %c0_i32 = arith.constant 0 : i32
    %c0_i32_0 = arith.constant 0 : i32
    return %arg0, %c0_i32 : i32, i32
  }
}

</mosaic_0001>

<bundles_post_ra>
// kernel: tpu_custom_call.1
= control target key start
LH: loop header
LB: loop body
LE: loop exit
PB: predicated region body
PF: predicated region fallthrough
CT: control target
= control target key end

     0   :  { %s168_s0 = inlined_call_operand.vmem [shape: f32[8,32], index: 0, kind: input, shape index: {}]   ;;  %s169_s1 = inlined_call_operand.vmem [shape: f32[32,8], index: 1, kind: input, shape index: {}]   ;;  %s170_s2 = inlined_call_operand.vmem [shape: f32[1,8], index: 2, kind: input, shape index: {}]   ;;  %s171_s3 = inlined_call_operand.hbm [shape: f32[8,8], index: 3, kind: output, shape index: {}]  }
   0x1   :  { %v19_v0 = vld [vmem:[%s169_s1 + $0x18] sm:$0xff]  ;;  %v18_v1 = vld [vmem:[%s169_s1 + $0x10] sm:$0xff]  ;;  %v17_v2 = vld [vmem:[%s169_s1 + $0x8] sm:$0xff] }
   0x2   :  { %40 = vmatpush.msra.mxu0 %v19_v0 }
   0x3   :  { %8 = vsyncpa [#allocation3], 0  ;;  %v16_v3 = vld [vmem:[%s169_s1] sm:$0xff]  ;;  %vm24_vm0 = vcmask 261120   ;;  %vm48_vm1 = vcmask 64512   ;;  %s81_s25 = sshll.u32 %s171_s3, 4  ;;  %s82_s25 = int_to_ptr.hbm [resolvable:$true] %s81_s25 }
   0x4   :  { %41 = vmatpush.msra.mxu0 %v18_v1  ;;  %v15_v4 = vld [vmem:[%s168_s0] sm:$0xff]  ;;  %s123_s0 = smov [#allocation2]  }
   0x5   :  { %v92_v5 = vld [vmem:[%s170_s2] ss:$0 sm:$0xff]  ;;  %s79_s1 = sshll.u32 %s123_s0, 4  ;;  %s80_s1 = int_to_ptr.vmem [resolvable:$true] %s79_s1 }
   0x6   :  { %42 = vmatpush.msra.mxu0 %v17_v2 }
   0x8   :  { %43 = vmatpush.msra.mxu0 %v16_v3 }
   0x9   :  { %90 = vmatmul.msk.f32.vlgmr.msra.gmra.mxu0 %vm24_vm0, %v15_v4 }
  0x86   :  { %v45_v6 = vpop.f32.mrf.mxu0 }
  0x87   :  { %v46_v7 = vadd.f32 %v92_v5, %v45_v6 }
  0x89   :  { %v49_v8 = vsel %vm48_vm1, %v46_v7, -inf }
  0x8a   :  { %50 = vmax.xlane.f32.xlu0 %v49_v8 }
  0xfd   :  { %v51_v9 = vpop.xlane.xlu0 %50 }
  0xfe   :  { %v52_v10 = vsub.f32 %v46_v7, %v51_v9 }
 0x100   :  { %v53_v11 = vmul.f32 1.442695, %v52_v10 }
 0x102   :  { %93 = vpow2.f32 %v53_v11 }
 0x108   :  { %v94_v12 = vpop.eup %93 }
 0x109   :  { %v55_v13 = vsel %vm48_vm1, %v94_v12, 0.0 }
 0x10a   :  { %56 = vadd.xlane.f32.xlu0 %v55_v13 }
 0x17d   :  { %v57_v14 = vpop.xlane.xlu0 %56 }
 0x17e   :  { %95 = vrcp.f32 %v57_v14  ;;  %v69_v18 = vand.u32 2147483648, %v57_v14  ;;  %v67_v20 = vand.u32 2147483647, %v57_v14  ;;  %vm63_vm3 = vweird.f32 %v57_v14 }
 0x180   :  { %v70_v22 = vor.u32 1.1754944e-38, %v69_v18  ;;  %vm68_vm5 = vcmp.eq.f32.partialorder %v67_v20, 8.507059e+37 }
 0x184   :  { %v96_v15 = vpop.eup %95 }
 0x185   :  { %v59_v16 = vmul.f32 %v96_v15, %v57_v14  ;;  %vm64_vm2 = vweird.f32 %v96_v15 }
 0x186   :  { %vm65_vm4 = vmor %vm63_vm3, %vm64_vm2 }
 0x187   :  { %v60_v17 = vsub.f32 1.0, %v59_v16 }
 0x189   :  { %v61_v19 = vmul.f32 %v96_v15, %v60_v17 }
 0x18b   :  { %v62_v21 = vadd.f32 %v96_v15, %v61_v19 }
 0x18d   :  { %v66_v23 = vsel %vm65_vm4, %v96_v15, %v62_v21 }
 0x18e   :  { %v71_v24 = vsel %vm68_vm5, %v70_v22, %v66_v23 }
 0x18f   :  { %v72_v25 = vmul.f32 %v94_v12, %v71_v24 }
 0x191   :  { %73 = vst.msk [vmem:[#allocation2] sm:$0xff] %vm48_vm1, %v72_v25 }
 0x192   :  { %84 = dma.vmem_to_hbm [thread:$0]  %s80_s1, 128, %s82_s25, [#allocation3]  }
 0x193   :  { %121 = dma.done.wait [#allocation3], 128  }
 0x194   :  { %122 = vsyncadd [#allocation3], 4294967168 }
 0x195   :  { %89 = vsyncpa [#allocation3], 1 }

</bundles_post_ra>
